<compile_context>
chip_gen: v7x
topology: tpu7x:2x2x1
jax: 0.10.0
libtpu: 0.0.40
codegen_flags: <defaults>
</compile_context>

<pallas_src>
import math

import jax
import jax.numpy as jnp
from jax import lax
from jax.experimental import pallas as pl
from jax.experimental.pallas import tpu as pltpu

_MiB = 1024 * 1024


def _vmem_budget_bytes():
    """Scoped-VMEM budget derived from the chip generation.

    128 MiB parts (v5e/v6e) -> ~112 MiB usable; 64 MiB parts (v7x) -> ~56 MiB.
    Headroom is left for compiler-internal scratch.
    """
    try:
        cap = int(pltpu.get_tpu_info().vmem_capacity_bytes)
    except Exception:  # interpret mode / unknown target
        cap = 64 * _MiB
    headroom = max(8 * _MiB, cap // 8)
    return cap - headroom


# --------------------------------------------------------------------------
# Fused single-pass kernel: one resident (Bt, C, HW) block per grid step.
# --------------------------------------------------------------------------
def _make_fused_kernel(eps, inv_hw, K, compute_dtype):
    inv_temp = 1.0 / 0.07          # softmax temperature of the cluster routing
    inv_k = 1.0 / K

    def kernel(x_ref, rm_ref, rv_ref, w_ref, b_ref, y_ref, dmv_ref):
        # x_ref block: (Bt, C, HW) -- NCHW-native, spatial axis on lanes.
        xf = x_ref[...].astype(jnp.float32)                   # (Bt, C, HW)

        # ---- exact (centered) per-instance statistics, f32 accumulation ----
        s1 = jnp.sum(xf, axis=2, keepdims=True)               # (Bt, C, 1)
        inst_mean = s1 * inv_hw
        cen = xf - inst_mean
        inst_var = jnp.sum(cen * cen, axis=2, keepdims=True) * inv_hw
        # xf / cen are dead past this point; the write path below reloads x in
        # its native dtype so the full-tile f32 temporaries do not stay live
        # across the small (C, K) routing math.

        rm = rm_ref[...]                                       # (C, K)
        rv = rv_ref[...]                                       # (C, K)

        # ---- cosine-similarity routing (F.normalize over C, eps=1e-12) ----
        rm_norm = rm / jnp.maximum(
            jnp.sqrt(jnp.sum(rm * rm, axis=0, keepdims=True)), 1e-12)
        im_norm = inst_mean / jnp.maximum(
            jnp.sqrt(jnp.sum(inst_mean * inst_mean, axis=1, keepdims=True)),
            1e-12)                                             # (Bt, C, 1)
        sim = jnp.sum(rm_norm[None] * im_norm, axis=1, keepdims=True)  # (Bt,1,K)

        # softmax over K (lane axis), temperature 0.07
        logits = sim * inv_temp
        logits = logits - jnp.max(logits, axis=2, keepdims=True)
        e = jnp.exp(logits)
        probs = e / jnp.sum(e, axis=2, keepdims=True)          # (Bt, 1, K)

        # ---- per-batch running-stat deltas (reduced over B in the wrapper) --
        dm = probs * (inst_mean - rm[None])                    # (Bt, C, K)
        dv = probs * (inst_var - rv[None])                     # (Bt, C, K)
        dmv_ref[...] = jnp.concatenate([dm, dv], axis=2)       # (Bt, C, 2K)

        # ---- mix running stats with instance stats (reuse dm/dv) ----
        mean_mat = rm[None] + dm                               # (Bt, C, K)
        var_mat = rv[None] + dv
        mean = jnp.sum(mean_mat, axis=2, keepdims=True) * inv_k       # (Bt,C,1)
        var = (jnp.sum(var_mat, axis=2, keepdims=True) * inv_k
               + jnp.sum(mean_mat * mean_mat, axis=2, keepdims=True) * inv_k
               - mean * mean)
        # NOTE: reference does not clamp; this only guards fp-degenerate
        # negative variances before the rsqrt.
        var = jnp.maximum(var, 0.0)

        # ---- fold affine into per-channel scale/shift: 2 ops on the big tile
        scale = lax.rsqrt(var + eps) * w_ref[...]              # (Bt, C, 1)
        shift = b_ref[...] - mean * scale
        xc = x_ref[...].astype(compute_dtype)
        y = xc * scale.astype(compute_dtype) + shift.astype(compute_dtype)
        y_ref[...] = y.astype(y_ref.dtype)

    return kernel


# --------------------------------------------------------------------------
# Two-pass fallback kernels (shapes that do not fit a single VMEM block).
# --------------------------------------------------------------------------
def _stats_kernel(x_ref, s1_ref, s2_ref, s1_sc, s2_sc):
    h = pl.program_id(1)

    @pl.when(h == 0)
    def _():
        s1_sc[...] = jnp.zeros_like(s1_sc)
        s2_sc[...] = jnp.zeros_like(s2_sc)

    xf = x_ref[0].astype(jnp.float32)                          # (C, thw)
    s1_sc[...] += jnp.sum(xf, axis=1, keepdims=True)
    s2_sc[...] += jnp.sum(xf * xf, axis=1, keepdims=True)

    @pl.when(h == pl.num_programs(1) - 1)
    def _():
        s1_ref[0] = s1_sc[...]
        s2_ref[0] = s2_sc[...]


def _make_normalize_kernel(compute_dtype):
    def kernel(x_ref, scale_ref, shift_ref, y_ref):
        s = scale_ref[...].astype(compute_dtype)               # (1, C, 1)
        t = shift_ref[...].astype(compute_dtype)
        y = x_ref[...].astype(compute_dtype) * s + t
        y_ref[...] = y.astype(y_ref.dtype)

    return kernel


def _pick_hw_tile(HW, C, itemsize, budget):
    """Largest spatial tile (multiple of 128 dividing HW, or HW itself) whose
    double-buffered in/out blocks plus f32 temp stay inside the budget."""
    per_elem = C * (2 * itemsize + 4)
    max_elems = max(128, budget // (3 * per_elem))
    if HW <= max_elems:
        return HW
    t = (min(max_elems, HW) // 128) * 128
    while t >= 128:
        if HW % t == 0:
            return t
        t -= 128
    # TODO(synk): masked last tile for HW not divisible by 128.
    return HW


# --------------------------------------------------------------------------
# Wrapper
# --------------------------------------------------------------------------
def unmixtns2d_forward(x, running_means_mat, running_vars_mat, weight, bias,
                       *, eps, momentum, force_two_pass=False, hw_tile=None):
    """x: (B, C, H, W) NCHW (PyTorch convention). Returns (y, new_rm, new_rv)."""
    B, C, H, W = x.shape
    K = running_means_mat.shape[0]
    HW = H * W
    itemsize = jnp.dtype(x.dtype).itemsize
    rm_dtype = running_means_mat.dtype
    rv_dtype = running_vars_mat.dtype
    # bf16 keeps a packed write path on v6e/v7x; on v5e the VPU casts anyway.
    compute_dtype = x.dtype if x.dtype == jnp.bfloat16 else jnp.float32

    budget = _vmem_budget_bytes()
    x3 = x.reshape(B, C, HW)              # free reshape: no transpose, no cast
    small_bytes = (8 * C * K + 4 * C) * 4

    def fused_footprint(bt):
        blk = bt * C * HW * itemsize      # native-dtype in / out blocks
        f32_tmp = 2 * bt * C * HW * 4     # xf + centered-square temporaries
        return 2 * (2 * blk) + f32_tmp + 2 * small_bytes + _MiB

    use_two_pass = force_two_pass or fused_footprint(1) > budget

    if not use_two_pass:
        # ---- single-pass fused path ------------------------------------
        # Pack batch elements until the block reaches ~1 MiB (amortizes the
        # ~0.35 us per-grid-step overhead) while staying inside the budget.
        target = 1 * _MiB
        bt = 1
        for d in range(1, B + 1):
            if B % d:
                continue
            if fused_footprint(d) > budget:
                break
            bt = d
            if d * C * HW * itemsize >= target:
                break
        grid_b = B // bt
        vmem_limit = int(min(max(int(1.25 * fused_footprint(bt)), 16 * _MiB),
                             budget))

        # Tiny (K, C) buffers -> (C, K): channels on sublanes, clusters on lanes.
        rm_t = jnp.transpose(running_means_mat.astype(jnp.float32))
        rv_t = jnp.transpose(running_vars_mat.astype(jnp.float32))
        w2 = weight.reshape(C, 1).astype(jnp.float32)
        b2 = bias.reshape(C, 1).astype(jnp.float32)
        # (rm/rv/w/b are grid-invariant; pipeline_mode=pl.Buffered(1) would trim
        # a few tiny buffers but is left at the default for robustness.)

        y3, dmv = pl.pallas_call(
            _make_fused_kernel(float(eps), 1.0 / HW, K, compute_dtype),
            out_shape=(
                jax.ShapeDtypeStruct((B, C, HW), x.dtype),
                jax.ShapeDtypeStruct((B, C, 2 * K), jnp.float32),
            ),
            grid_spec=pltpu.PrefetchScalarGridSpec(
                num_scalar_prefetch=0,
                grid=(grid_b,),
                in_specs=[
                    pl.BlockSpec((bt, C, HW), lambda b: (b, 0, 0)),
                    pl.BlockSpec((C, K), lambda b: (0, 0)),
                    pl.BlockSpec((C, K), lambda b: (0, 0)),
                    pl.BlockSpec((C, 1), lambda b: (0, 0)),
                    pl.BlockSpec((C, 1), lambda b: (0, 0)),
                ],
                out_specs=[
                    pl.BlockSpec((bt, C, HW), lambda b: (b, 0, 0)),
                    pl.BlockSpec((bt, C, 2 * K), lambda b: (b, 0, 0)),
                ],
            ),
            compiler_params=pltpu.CompilerParams(
                dimension_semantics=("parallel",),
                vmem_limit_bytes=vmem_limit,
            ),
        )(x3, rm_t, rv_t, w2, b2)

        dm = dmv[:, :, :K]                                     # (B, C, K)
        dv = dmv[:, :, K:]
        dm_mean = jnp.transpose(jnp.sum(dm, axis=0)) / B       # (K, C)
        dv_mean = jnp.transpose(jnp.sum(dv, axis=0)) / B
        new_rm = (running_means_mat.astype(jnp.float32)
                  + momentum * dm_mean).astype(rm_dtype)
        new_rv = (running_vars_mat.astype(jnp.float32)
                  + momentum * dv_mean).astype(rv_dtype)
        return y3.reshape(B, C, H, W), new_rm, new_rv

    # ---- two-pass fallback: (1, C, HW) does not fit the VMEM budget --------
    # Pass 1 tiles the spatial axis ("arbitrary" reduction axis) and
    # accumulates per-(b, c) sum / sum-of-squares; the tiny (B, C, K) routing
    # math runs as plain JAX; pass 2 is a trivially tiled y = x*scale + shift.
    # Costs ~1.5x HBM traffic vs the fused path but always fits VMEM (v7x).
    thw = hw_tile if hw_tile is not None else _pick_hw_tile(HW, C, itemsize,
                                                            budget)
    n_hw = HW // thw
    vmem_limit_1 = int(min(max(6 * C * thw * (itemsize + 4) + 4 * small_bytes
                               + 4 * _MiB, 16 * _MiB), budget))

    s1, s2 = pl.pallas_call(
        _stats_kernel,
        out_shape=(
            jax.ShapeDtypeStruct((B, C, 1), jnp.float32),
            jax.ShapeDtypeStruct((B, C, 1), jnp.float32),
        ),
        grid_spec=pltpu.PrefetchScalarGridSpec(
            num_scalar_prefetch=0,
            grid=(B, n_hw),
            in_specs=[pl.BlockSpec((1, C, thw), lambda b, h: (b, 0, h))],
            out_specs=[
                pl.BlockSpec((1, C, 1), lambda b, h: (b, 0, 0)),
                pl.BlockSpec((1, C, 1), lambda b, h: (b, 0, 0)),
            ],
            scratch_shapes=[pltpu.VMEM((C, 1), jnp.float32),
                            pltpu.VMEM((C, 1), jnp.float32)],
        ),
        compiler_params=pltpu.CompilerParams(
            dimension_semantics=("parallel", "arbitrary"),
            vmem_limit_bytes=vmem_limit_1,
        ),
    )(x3)

    inv_hw = 1.0 / HW
    inst_mean = s1[:, :, 0] * inv_hw                           # (B, C)
    # TODO(synk): a Welford/Chan-style tile combination in pass 1 would avoid
    # the one-pass E[x^2]-mean^2 cancellation for extreme |mean|/std ratios.
    inst_var = jnp.maximum(s2[:, :, 0] * inv_hw - inst_mean * inst_mean, 0.0)

    rm = running_means_mat.astype(jnp.float32)                 # (K, C)
    rv = running_vars_mat.astype(jnp.float32)
    rm_n = rm / jnp.maximum(jnp.linalg.norm(rm, axis=1, keepdims=True), 1e-12)
    im_n = inst_mean / jnp.maximum(
        jnp.linalg.norm(inst_mean, axis=1, keepdims=True), 1e-12)
    probs = jax.nn.softmax((im_n @ rm_n.T) / 0.07, axis=1)     # (B, K)
    p = probs[:, :, None]                                      # (B, K, 1)
    dm = p * (inst_mean[:, None, :] - rm[None])                # (B, K, C)
    dv = p * (inst_var[:, None, :] - rv[None])
    mean_mat = rm[None] + dm
    var_mat = rv[None] + dv
    mean = jnp.mean(mean_mat, axis=1)                          # (B, C)
    var = (jnp.mean(var_mat, axis=1) + jnp.mean(mean_mat * mean_mat, axis=1)
           - mean * mean)
    var = jnp.maximum(var, 0.0)
    scale = lax.rsqrt(var + eps) * weight[None].astype(jnp.float32)
    shift = bias[None].astype(jnp.float32) - mean * scale

    new_rm = (rm + momentum * jnp.mean(dm, axis=0)).astype(rm_dtype)
    new_rv = (rv + momentum * jnp.mean(dv, axis=0)).astype(rv_dtype)

    scale3 = scale[:, :, None]                                 # (B, C, 1)
    shift3 = shift[:, :, None]
    vmem_limit_2 = int(min(max(8 * C * thw * max(itemsize, 4) + 4 * _MiB,
                               16 * _MiB), budget))

    y3 = pl.pallas_call(
        _make_normalize_kernel(compute_dtype),
        out_shape=jax.ShapeDtypeStruct((B, C, HW), x.dtype),
        grid_spec=pltpu.PrefetchScalarGridSpec(
            num_scalar_prefetch=0,
            grid=(B, n_hw),
            in_specs=[
                pl.BlockSpec((1, C, thw), lambda b, h: (b, 0, h)),
                pl.BlockSpec((1, C, 1), lambda b, h: (b, 0, 0)),
                pl.BlockSpec((1, C, 1), lambda b, h: (b, 0, 0)),
            ],
            out_specs=pl.BlockSpec((1, C, thw), lambda b, h: (b, 0, h)),
        ),
        compiler_params=pltpu.CompilerParams(
            dimension_semantics=("parallel", "parallel"),
            vmem_limit_bytes=vmem_limit_2,
        ),
    )(x3, scale3, shift3)

    return y3.reshape(B, C, H, W), new_rm, new_rv


def unmixtns2d_reference(x, rm, rv, weight, bias, *, eps, momentum):
    """Pure-JAX reference mirroring the PyTorch forward exactly."""
    B, C, H, W = x.shape
    inst_mean = jnp.mean(x, axis=(2, 3))
    inst_var = jnp.mean((x - inst_mean[:, :, None, None]) ** 2, axis=(2, 3))
    rm_n = rm / jnp.maximum(jnp.linalg.norm(rm, axis=1, keepdims=True), 1e-12)
    im_n = inst_mean / jnp.maximum(
        jnp.linalg.norm(inst_mean, axis=1, keepdims=True), 1e-12)
    sim = im_n @ rm_n.T
    probs = jax.nn.softmax(sim / 0.07, axis=1)
    p = probs[:, :, None]
    mean_mat = (1.0 - p) * rm[None] + p * inst_mean[:, None, :]
    var_mat = (1.0 - p) * rv[None] + p * inst_var[:, None, :]
    mean = jnp.mean(mean_mat, axis=1)
    var = (jnp.mean(var_mat, axis=1) + jnp.mean(mean_mat ** 2, axis=1)
           - mean ** 2)
    new_rm = rm + momentum * jnp.mean(p * (inst_mean[:, None, :] - rm[None]),
                                      axis=0)
    new_rv = rv + momentum * jnp.mean(p * (inst_var[:, None, :] - rv[None]),
                                      axis=0)
    y = (x - mean[:, :, None, None]) / jnp.sqrt(var[:, :, None, None] + eps)
    y = y * weight.reshape(1, -1, 1, 1) + bias.reshape(1, -1, 1, 1)
    return y, new_rm, new_rv


if __name__ == "__main__":
    B, C, H, W = 2, 4, 16, 16
    K = 16
    momentum = 0.1
    eps = 1e-5

    key = jax.random.PRNGKey(0)
    k1, k2, k3, k4, k5, k6 = jax.random.split(key, 6)

    # Deterministic synthetic "bn_layer" parameters (BaseNormLayer.__init__).
    running_mean = 0.1 * jax.random.normal(k1, (C,), dtype=jnp.float32)
    running_var = jax.random.uniform(k2, (C,), minval=0.5, maxval=1.5,
                                     dtype=jnp.float32)
    weight = 1.0 + 0.1 * jax.random.normal(k3, (C,), dtype=jnp.float32)
    bias = 0.1 * jax.random.normal(k4, (C,), dtype=jnp.float32)

    coeff = 0.5
    running_means_mat = jnp.tile(running_mean, (K, 1))
    running_vars_mat = jnp.tile(running_var, (K, 1))
    noise = (math.sqrt(coeff * K / (K - 1))
             * jnp.sqrt(running_vars_mat)
             * jax.random.normal(k5, running_means_mat.shape, dtype=jnp.float32))
    running_means_mat = running_means_mat + noise
    running_vars_mat = (1.0 - coeff) * running_vars_mat

    x = jax.random.normal(k6, (B, C, H, W), dtype=jnp.float32)

    # Fast path: fused single-block kernel with batch packing.
    y, new_rm, new_rv = unmixtns2d_forward(
        x, running_means_mat, running_vars_mat, weight, bias,
        eps=eps, momentum=momentum)
    jax.block_until_ready((y, new_rm, new_rv))

    # Also exercise the two-pass VMEM-fallback path with a tiled spatial axis.
    y2, rm2, rv2 = unmixtns2d_forward(
        x, running_means_mat, running_vars_mat, weight, bias,
        eps=eps, momentum=momentum, force_two_pass=True, hw_tile=128)
    jax.block_until_ready((y2, rm2, rv2))

    y_ref, rm_ref, rv_ref = unmixtns2d_reference(
        x, running_means_mat, running_vars_mat, weight, bias,
        eps=eps, momentum=momentum)

    assert y.shape == (B, C, H, W)
    assert jnp.allclose(y, y_ref, atol=1e-3, rtol=1e-3)
    assert jnp.allclose(new_rm, rm_ref, atol=1e-4, rtol=1e-3)
    assert jnp.allclose(new_rv, rv_ref, atol=1e-4, rtol=1e-3)
    assert jnp.allclose(y2, y_ref, atol=1e-3, rtol=1e-3)
    assert jnp.allclose(rm2, rm_ref, atol=1e-4, rtol=1e-3)
    assert jnp.allclose(rv2, rv_ref, atol=1e-4, rtol=1e-3)

    print("KERNEL_OK")
</pallas_src>

<mosaic_0001>
module attributes {stable_mosaic.version = 11 : i64} {
  func.func @kernel(%arg0: i32, %arg1: memref<2x4x256xf32, #tpu.memory_space<vmem>>, %arg2: memref<4x16xf32, #tpu.memory_space<vmem>>, %arg3: memref<4x16xf32, #tpu.memory_space<vmem>>, %arg4: memref<4x1xf32, #tpu.memory_space<vmem>>, %arg5: memref<4x1xf32, #tpu.memory_space<vmem>>, %arg6: memref<2x4x256xf32, #tpu.memory_space<vmem>>, %arg7: memref<2x4x32xf32, #tpu.memory_space<vmem>>) attributes {dimension_semantics = [#tpu.dimension_semantics<parallel>], iteration_bounds = array<i64: 1>, scalar_prefetch = 0 : i64, scratch_operands = 0 : i64, tpu.core_type = #tpu.core_type<tc>, window_params = [{transform_indices = @transform_0, window_bounds = array<i64: 2, 4, 256>}, {pipeline_mode = #tpu.pipeline_mode<synchronous>, transform_indices = @transform_1, window_bounds = array<i64: 4, 16>}, {pipeline_mode = #tpu.pipeline_mode<synchronous>, transform_indices = @transform_2, window_bounds = array<i64: 4, 16>}, {pipeline_mode = #tpu.pipeline_mode<synchronous>, transform_indices = @transform_3, window_bounds = array<i64: 4, 1>}, {pipeline_mode = #tpu.pipeline_mode<synchronous>, transform_indices = @transform_4, window_bounds = array<i64: 4, 1>}, {transform_indices = @transform_5, window_bounds = array<i64: 2, 4, 256>}, {transform_indices = @transform_6, window_bounds = array<i64: 2, 4, 32>}]} {
    %c0 = arith.constant 0 : index
    %c0_0 = arith.constant 0 : index
    %c0_1 = arith.constant 0 : index
    %0 = vector.load %arg1[%c0, %c0_0, %c0_1] : memref<2x4x256xf32, #tpu.memory_space<vmem>>, vector<2x4x256xf32>
    %cst = arith.constant dense<0.000000e+00> : vector<2x4xf32>
    %1 = vector.multi_reduction <add>, %0, %cst [2] : vector<2x4x256xf32> to vector<2x4xf32>
    %2 = vector.shape_cast %1 : vector<2x4xf32> to vector<2x4x1xf32>
    %cst_2 = arith.constant 3.906250e-03 : f32
    %3 = vector.broadcast %cst_2 : f32 to vector<2x4x1xf32>
    %4 = arith.mulf %2, %3 : vector<2x4x1xf32>
    %5 = vector.broadcast %4 : vector<2x4x1xf32> to vector<2x4x256xf32>
    %6 = arith.subf %0, %5 : vector<2x4x256xf32>
    %7 = arith.mulf %6, %6 : vector<2x4x256xf32>
    %cst_3 = arith.constant dense<0.000000e+00> : vector<2x4xf32>
    %8 = vector.multi_reduction <add>, %7, %cst_3 [2] : vector<2x4x256xf32> to vector<2x4xf32>
    %9 = vector.shape_cast %8 : vector<2x4xf32> to vector<2x4x1xf32>
    %cst_4 = arith.constant 3.906250e-03 : f32
    %10 = vector.broadcast %cst_4 : f32 to vector<2x4x1xf32>
    %11 = arith.mulf %9, %10 : vector<2x4x1xf32>
    %c0_5 = arith.constant 0 : index
    %c0_6 = arith.constant 0 : index
    %12 = vector.load %arg2[%c0_5, %c0_6] : memref<4x16xf32, #tpu.memory_space<vmem>>, vector<4x16xf32>
    %c0_7 = arith.constant 0 : index
    %c0_8 = arith.constant 0 : index
    %13 = vector.load %arg3[%c0_7, %c0_8] : memref<4x16xf32, #tpu.memory_space<vmem>>, vector<4x16xf32>
    %14 = arith.mulf %12, %12 : vector<4x16xf32>
    %cst_9 = arith.constant dense<0.000000e+00> : vector<16xf32>
    %15 = vector.multi_reduction <add>, %14, %cst_9 [0] : vector<4x16xf32> to vector<16xf32>
    %16 = vector.shape_cast %15 : vector<16xf32> to vector<1x16xf32>
    %17 = math.sqrt %16 : vector<1x16xf32>
    %cst_10 = arith.constant 9.99999996E-13 : f32
    %18 = vector.broadcast %cst_10 : f32 to vector<1x16xf32>
    %19 = arith.maximumf %17, %18 : vector<1x16xf32>
    %20 = vector.broadcast %19 : vector<1x16xf32> to vector<4x16xf32>
    %21 = arith.divf %12, %20 : vector<4x16xf32>
    %22 = arith.mulf %4, %4 : vector<2x4x1xf32>
    %cst_11 = arith.constant dense<0.000000e+00> : vector<2x1xf32>
    %23 = vector.multi_reduction <add>, %22, %cst_11 [1] : vector<2x4x1xf32> to vector<2x1xf32>
    %24 = vector.shape_cast %23 : vector<2x1xf32> to vector<2x1x1xf32>
    %25 = math.sqrt %24 : vector<2x1x1xf32>
    %cst_12 = arith.constant 9.99999996E-13 : f32
    %26 = vector.broadcast %cst_12 : f32 to vector<2x1x1xf32>
    %27 = arith.maximumf %25, %26 : vector<2x1x1xf32>
    %28 = vector.broadcast %27 : vector<2x1x1xf32> to vector<2x4x1xf32>
    %29 = arith.divf %4, %28 : vector<2x4x1xf32>
    %30 = vector.shape_cast %21 : vector<4x16xf32> to vector<1x4x16xf32>
    %31 = vector.broadcast %30 : vector<1x4x16xf32> to vector<2x4x16xf32>
    %32 = vector.broadcast %29 : vector<2x4x1xf32> to vector<2x4x16xf32>
    %33 = arith.mulf %31, %32 : vector<2x4x16xf32>
    %cst_13 = arith.constant dense<0.000000e+00> : vector<2x16xf32>
    %34 = vector.multi_reduction <add>, %33, %cst_13 [1] : vector<2x4x16xf32> to vector<2x16xf32>
    %35 = vector.shape_cast %34 : vector<2x16xf32> to vector<2x1x16xf32>
    %cst_14 = arith.constant 14.2857141 : f32
    %36 = vector.broadcast %cst_14 : f32 to vector<2x1x16xf32>
    %37 = arith.mulf %35, %36 : vector<2x1x16xf32>
    %cst_15 = arith.constant dense<0xFF800000> : vector<2x1xf32>
    %38 = vector.multi_reduction <maximumf>, %37, %cst_15 [2] : vector<2x1x16xf32> to vector<2x1xf32>
    %39 = vector.shape_cast %38 : vector<2x1xf32> to vector<2x1x1xf32>
    %40 = vector.broadcast %39 : vector<2x1x1xf32> to vector<2x1x16xf32>
    %41 = arith.subf %37, %40 : vector<2x1x16xf32>
    %42 = math.exp %41 : vector<2x1x16xf32>
    %cst_16 = arith.constant dense<0.000000e+00> : vector<2x1xf32>
    %43 = vector.multi_reduction <add>, %42, %cst_16 [2] : vector<2x1x16xf32> to vector<2x1xf32>
    %44 = vector.shape_cast %43 : vector<2x1xf32> to vector<2x1x1xf32>
    %45 = vector.broadcast %44 : vector<2x1x1xf32> to vector<2x1x16xf32>
    %46 = arith.divf %42, %45 : vector<2x1x16xf32>
    %47 = vector.shape_cast %12 : vector<4x16xf32> to vector<1x4x16xf32>
    %48 = vector.broadcast %4 : vector<2x4x1xf32> to vector<2x4x16xf32>
    %49 = vector.broadcast %47 : vector<1x4x16xf32> to vector<2x4x16xf32>
    %50 = arith.subf %48, %49 : vector<2x4x16xf32>
    %51 = vector.broadcast %46 : vector<2x1x16xf32> to vector<2x4x16xf32>
    %52 = arith.mulf %51, %50 : vector<2x4x16xf32>
    %53 = vector.shape_cast %13 : vector<4x16xf32> to vector<1x4x16xf32>
    %54 = vector.broadcast %11 : vector<2x4x1xf32> to vector<2x4x16xf32>
    %55 = vector.broadcast %53 : vector<1x4x16xf32> to vector<2x4x16xf32>
    %56 = arith.subf %54, %55 : vector<2x4x16xf32>
    %57 = vector.broadcast %46 : vector<2x1x16xf32> to vector<2x4x16xf32>
    %58 = arith.mulf %57, %56 : vector<2x4x16xf32>
    %59 = tpu.concatenate %52, %58 in 2 : vector<2x4x16xf32>, vector<2x4x16xf32> -> vector<2x4x32xf32>
    %c0_17 = arith.constant 0 : index
    %c0_18 = arith.constant 0 : index
    %c0_19 = arith.constant 0 : index
    %60 = vector.load %arg7[%c0_17, %c0_18, %c0_19] : memref<2x4x32xf32, #tpu.memory_space<vmem>>, vector<2x4x32xf32>
    tpu.vector_store %arg7[%c0_17, %c0_18, %c0_19], %59 {strides = array<i32>} : memref<2x4x32xf32, #tpu.memory_space<vmem>>, vector<2x4x32xf32>,
    %61 = vector.shape_cast %12 : vector<4x16xf32> to vector<1x4x16xf32>
    %62 = vector.broadcast %61 : vector<1x4x16xf32> to vector<2x4x16xf32>
    %63 = arith.addf %62, %52 : vector<2x4x16xf32>
    %64 = vector.shape_cast %13 : vector<4x16xf32> to vector<1x4x16xf32>
    %65 = vector.broadcast %64 : vector<1x4x16xf32> to vector<2x4x16xf32>
    %66 = arith.addf %65, %58 : vector<2x4x16xf32>
    %cst_20 = arith.constant dense<0.000000e+00> : vector<2x4xf32>
    %67 = vector.multi_reduction <add>, %63, %cst_20 [2] : vector<2x4x16xf32> to vector<2x4xf32>
    %68 = vector.shape_cast %67 : vector<2x4xf32> to vector<2x4x1xf32>
    %cst_21 = arith.constant 6.250000e-02 : f32
    %69 = vector.broadcast %cst_21 : f32 to vector<2x4x1xf32>
    %70 = arith.mulf %68, %69 : vector<2x4x1xf32>
    %cst_22 = arith.constant dense<0.000000e+00> : vector<2x4xf32>
    %71 = vector.multi_reduction <add>, %66, %cst_22 [2] : vector<2x4x16xf32> to vector<2x4xf32>
    %72 = vector.shape_cast %71 : vector<2x4xf32> to vector<2x4x1xf32>
    %cst_23 = arith.constant 6.250000e-02 : f32
    %73 = vector.broadcast %cst_23 : f32 to vector<2x4x1xf32>
    %74 = arith.mulf %72, %73 : vector<2x4x1xf32>
    %75 = arith.mulf %63, %63 : vector<2x4x16xf32>
    %cst_24 = arith.constant dense<0.000000e+00> : vector<2x4xf32>
    %76 = vector.multi_reduction <add>, %75, %cst_24 [2] : vector<2x4x16xf32> to vector<2x4xf32>
    %77 = vector.shape_cast %76 : vector<2x4xf32> to vector<2x4x1xf32>
    %cst_25 = arith.constant 6.250000e-02 : f32
    %78 = vector.broadcast %cst_25 : f32 to vector<2x4x1xf32>
    %79 = arith.mulf %77, %78 : vector<2x4x1xf32>
    %80 = arith.addf %74, %79 : vector<2x4x1xf32>
    %81 = arith.mulf %70, %70 : vector<2x4x1xf32>
    %82 = arith.subf %80, %81 : vector<2x4x1xf32>
    %cst_26 = arith.constant 0.000000e+00 : f32
    %83 = vector.broadcast %cst_26 : f32 to vector<2x4x1xf32>
    %84 = arith.maximumf %82, %83 : vector<2x4x1xf32>
    %cst_27 = arith.constant 9.99999974E-6 : f32
    %85 = vector.broadcast %cst_27 : f32 to vector<2x4x1xf32>
    %86 = arith.addf %84, %85 : vector<2x4x1xf32>
    %87 = math.rsqrt %86 : vector<2x4x1xf32>
    %c0_28 = arith.constant 0 : index
    %c0_29 = arith.constant 0 : index
    %88 = vector.load %arg4[%c0_28, %c0_29] : memref<4x1xf32, #tpu.memory_space<vmem>>, vector<4x1xf32>
    %89 = vector.shape_cast %88 : vector<4x1xf32> to vector<1x4x1xf32>
    %90 = vector.broadcast %89 : vector<1x4x1xf32> to vector<2x4x1xf32>
    %91 = arith.mulf %87, %90 : vector<2x4x1xf32>
    %c0_30 = arith.constant 0 : index
    %c0_31 = arith.constant 0 : index
    %92 = vector.load %arg5[%c0_30, %c0_31] : memref<4x1xf32, #tpu.memory_space<vmem>>, vector<4x1xf32>
    %93 = arith.mulf %70, %91 : vector<2x4x1xf32>
    %94 = vector.shape_cast %92 : vector<4x1xf32> to vector<1x4x1xf32>
    %95 = vector.broadcast %94 : vector<1x4x1xf32> to vector<2x4x1xf32>
    %96 = arith.subf %95, %93 : vector<2x4x1xf32>
    %c0_32 = arith.constant 0 : index
    %c0_33 = arith.constant 0 : index
    %c0_34 = arith.constant 0 : index
    %97 = vector.load %arg1[%c0_32, %c0_33, %c0_34] : memref<2x4x256xf32, #tpu.memory_space<vmem>>, vector<2x4x256xf32>
    %98 = vector.broadcast %91 : vector<2x4x1xf32> to vector<2x4x256xf32>
    %99 = arith.mulf %97, %98 : vector<2x4x256xf32>
    %100 = vector.broadcast %96 : vector<2x4x1xf32> to vector<2x4x256xf32>
    %101 = arith.addf %99, %100 : vector<2x4x256xf32>
    %c0_35 = arith.constant 0 : index
    %c0_36 = arith.constant 0 : index
    %c0_37 = arith.constant 0 : index
    %102 = vector.load %arg6[%c0_35, %c0_36, %c0_37] : memref<2x4x256xf32, #tpu.memory_space<vmem>>, vector<2x4x256xf32>
    tpu.vector_store %arg6[%c0_35, %c0_36, %c0_37], %101 {strides = array<i32>} : memref<2x4x256xf32, #tpu.memory_space<vmem>>, vector<2x4x256xf32>,
    return
  }
  func.func @transform_0(%arg0: i32) -> (i32, i32, i32) {
    %c0_i32 = arith.constant 0 : i32
    %c0_i32_0 = arith.constant 0 : i32
    %c0_i32_1 = arith.constant 0 : i32
    return %arg0, %c0_i32, %c0_i32_0 : i32, i32, i32
  }
  func.func @transform_1(%arg0: i32) -> (i32, i32) {
    %c0_i32 = arith.constant 0 : i32
    %c0_i32_0 = arith.constant 0 : i32
    %c0_i32_1 = arith.constant 0 : i32
    return %c0_i32, %c0_i32_0 : i32, i32
  }
  func.func @transform_2(%arg0: i32) -> (i32, i32) {
    %c0_i32 = arith.constant 0 : i32
    %c0_i32_0 = arith.constant 0 : i32
    %c0_i32_1 = arith.constant 0 : i32
    return %c0_i32, %c0_i32_0 : i32, i32
  }
  func.func @transform_3(%arg0: i32) -> (i32, i32) {
    %c0_i32 = arith.constant 0 : i32
    %c0_i32_0 = arith.constant 0 : i32
    %c0_i32_1 = arith.constant 0 : i32
    return %c0_i32, %c0_i32_0 : i32, i32
  }
  func.func @transform_4(%arg0: i32) -> (i32, i32) {
    %c0_i32 = arith.constant 0 : i32
    %c0_i32_0 = arith.constant 0 : i32
    %c0_i32_1 = arith.constant 0 : i32
    return %c0_i32, %c0_i32_0 : i32, i32
  }
  func.func @transform_5(%arg0: i32) -> (i32, i32, i32) {
    %c0_i32 = arith.constant 0 : i32
    %c0_i32_0 = arith.constant 0 : i32
    %c0_i32_1 = arith.constant 0 : i32
    return %arg0, %c0_i32, %c0_i32_0 : i32, i32, i32
  }
  func.func @transform_6(%arg0: i32) -> (i32, i32, i32) {
    %c0_i32 = arith.constant 0 : i32
    %c0_i32_0 = arith.constant 0 : i32
    %c0_i32_1 = arith.constant 0 : i32
    return %arg0, %c0_i32, %c0_i32_0 : i32, i32, i32
  }
}

</mosaic_0001>

<bundles_post_ra>
// kernel: tpu_custom_call.1
= control target key start
LH: loop header
LB: loop body
LE: loop exit
PB: predicated region body
PF: predicated region fallthrough
CT: control target
= control target key end

     0   :  { %12 = vsyncpa [#allocation3], 0  ;;  %s650_s0 = inlined_call_operand.hbm [shape: f32[2,4,256], index: 0, kind: input, shape index: {}]   ;;  %s651_s1 = inlined_call_operand.vmem [shape: f32[4,16], index: 1, kind: input, shape index: {}]   ;;  %s652_s2 = inlined_call_operand.vmem [shape: f32[4,16], index: 2, kind: input, shape index: {}]   ;;  %s653_s3 = inlined_call_operand.vmem [shape: f32[4,1], index: 3, kind: input, shape index: {}]   ;;  %s654_s4 = inlined_call_operand.vmem [shape: f32[4,1], index: 4, kind: input, shape index: {}]   ;;  %s655_s5 = inlined_call_operand.hbm [shape: f32[2,4,256], index: 5, kind: output, shape index: {0}]   ;;  %s656_s6 = inlined_call_operand.hbm [shape: f32[2,4,32], index: 6, kind: output, shape index: {1}]  }
   0x1   :  { %13 = vsyncpa [#allocation4], 0 }
   0x2   :  { %14 = vsyncpa [#allocation7], 0  ;;  %s467_s21 = smov [#allocation2]   ;;  %s395_s25 = scalar_lea.hbm %s650_s0, 256 }
   0x3   :  { %s20_s22 = sshll.u32 %s467_s21, 4  ;;  %p396_p0 = scmp.ne.s32.totalorder %s650_s0, %s395_s25  ;;  %s21_s22 = int_to_ptr.vmem [resolvable:$true] %s20_s22 }
   0x4   :  { %p399_p1 = scmp.lt.u32.totalorder %s395_s25, %s650_s0 }
   0x6   :  { %p401_p2 = pnand %p399_p1, %p396_p0 }
   0x8   :  { %404 = shalt.err (!%p401_p2)
}
   0x9   :  { %s405_s30 = scalar_lea.vmem %s21_s22, 256  ;;  %p410_p4 = scmp.lt.s32.totalorder %s21_s22, %s21_s22 }
   0xa   :  { %p406_p3 = scmp.ne.s32.totalorder %s21_s22, %s405_s30  ;;  %p411_p5 = scmp.lt.s32.totalorder %s405_s30, %s405_s30 }
   0xc   :  { %p412_p6 = por %p411_p5, %p410_p4 }
   0xe   :  { %p413_p7 = pnand %p412_p6, %p406_p3 }
  0x10   :  { %416 = shalt.err (!%p413_p7)
}
  0x11   :  { %s468_s7 = smov 128   ;;  %s469_s8 = smov 8  }
  0x12   :  { %26 = dma.hbm_to_vmem [thread:$0]  %s650_s0, 256, %s21_s22, [#allocation3], %s468_s7, %s468_s7, %s469_s8  }
  0x13   :  { %461 = dma.done.wait [#allocation3], 256  }
  0x14   :  { %462 = vsyncadd [#allocation3], 4294967040  ;;  %vm46_vm0 = vcmask 1043456   ;;  %v527_v0 = vld [vmem:[#allocation2] sm:$0xff]  ;;  %v529_v1 = vld [vmem:[#allocation2 + $0x8] sm:$0xff]  ;;  %vm102_vm1 = vcmask 125952  }
  0x15   :  { %v42_v2 = vcombine.high %v527_v0, %v527_v0  ;;  %v47_v3 = vsel %vm46_vm0, %v527_v0, 0.0  ;;  %v43_v4 = vcombine.high %v529_v1, %v529_v1  ;;  %v52_v6 = vsel %vm46_vm0, %v529_v1, 0.0  ;;  %v544_v10 = vld [vmem:[%s651_s1] sm:$0xf]  ;;  %s472_s16 = smov 16   ;;  %s474_s17 = smov [#allocation6]  }
  0x16   :  { %v101_v11 = vmul.f32 %v544_v10, %v544_v10  ;;  %vm174_vm8 = vcmask 130048   ;;  %vm215_vm9 = vcmask 257024   ;;  %s341_s18 = sshll.u32 %s474_s17, 4  ;;  %s342_s18 = int_to_ptr.vmem [resolvable:$true] %s341_s18 }
  0x17   :  { %v48_v5 = vsel %vm46_vm0, %v42_v2, 0.0  ;;  %v53_v7 = vsel %vm46_vm0, %v43_v4, 0.0 }
  0x18   :  { %v49_v8 = vadd.f32 %v48_v5, %v47_v3  ;;  %v54_v9 = vadd.f32 %v53_v7, %v52_v6  ;;  %v103_v12 = vsel %vm102_vm1, %v101_v11, 0.0 }
  0x19   :  { %v104_v13 = vrot.slane %v103_v12, 4 }
  0x1a   :  { %50 = vadd.xlane.f32.xlu0 %v49_v8 }
  0x1b   :  { %v105_v14 = vadd.f32 %v104_v13, %v103_v12 }
  0x1d   :  { %v106_v15 = vrot.slane %v105_v14, 2 }
  0x1e   :  { %55 = vadd.xlane.f32.xlu0 %v54_v9 }
  0x1f   :  { %v107_v16 = vadd.f32 %v106_v15, %v105_v14 }
  0x21   :  { %v108_v17 = vrot.slane %v107_v16, 1 }
  0x23   :  { %v109_v19 = vadd.f32 %v108_v17, %v107_v16 }
  0x25   :  { %371 = vrsqrt.f32 %v109_v19  ;;  %vm112_vm2 = vcmp.eq.f32.partialorder %v109_v19, inf  ;;  %v115_v40 = vand.u32 2147483648, %v109_v19  ;;  %vm114_vm3 = vcmp.eq.f32.partialorder %v109_v19, 0.0 }
  0x2f   :  { %v372_v33 = vpop.eup %371 }
  0x30   :  { %v111_v38 = vmul.f32 %v372_v33, %v109_v19 }
  0x32   :  { %v113_v42 = vsel %vm112_vm2, %v109_v19, %v111_v38 }
  0x33   :  { %v116_v43 = vsel %vm114_vm3, %v115_v40, %v113_v42 }
  0x34   :  { %v117_v44 = vmax.f32 %v116_v43, 1e-12 }
  0xa7   :  { %v51_v18 = vpop.xlane.xlu0 %50 }
  0xa8   :  { %v549_v20 = vmul.f32 0.00390625, %v51_v18 }
  0xaa   :  { %v120_v21 = vmul.f32 %v549_v20, %v549_v20 }
  0xab   :  { %v56_v22 = vpop.xlane.xlu0 %55 }
  0xac   :  { %v122_v23 = vsel %vm46_vm0, %v120_v21, 0.0  ;;  %v554_v24 = vmul.f32 0.00390625, %v56_v22 }
  0xad   :  { %v123_v25 = vrot.slane %v122_v23, 4 }
  0xae   :  { %v121_v26 = vmul.f32 %v554_v24, %v554_v24 }
  0xaf   :  { %v124_v27 = vadd.f32 %v123_v25, %v122_v23  ;;  %v470_v23 = vmov 839922192  }
  0xb0   :  { %v129_v28 = vsel %vm46_vm0, %v121_v26, 0.0  ;;  %v62_v25 = vunpack.c.l.s4 %v470_v23  ;;  %v64_v26 = vlaneseq  ;;  %v471_v23 = vmov 0  }
  0xb1   :  { %v125_v29 = vrot.slane %v124_v27, 2  ;;  %v130_v30 = vrot.slane %v129_v28, 4  ;;  %367 = vset.pattern.permute.xlu0 %v471_v23  ;;  %368 = vset.pattern.permute.xlu1 %v471_v23 }
  0xb3   :  { %v126_v31 = vadd.f32 %v125_v29, %v124_v27  ;;  %v131_v32 = vadd.f32 %v130_v30, %v129_v28  ;;  %v63_v27 = vunpack.c.0.s8 %v62_v25  ;;  %v65_v28 = vshrl.u32 %v64_v26, 7 }
  0xb5   :  { %v127_v34 = vrot.slane %v126_v31, 1  ;;  %v132_v35 = vrot.slane %v131_v32, 2  ;;  %v566_v29 = vsub.s32 %v63_v27, %v65_v28 }
  0xb7   :  { %v128_v36 = vadd.f32 %v127_v34, %v126_v31  ;;  %v133_v37 = vadd.f32 %v132_v35, %v131_v32  ;;  %v67_v31 = vrot.slane %v549_v20, %v566_v29 }
  0xb9   :  { %373 = vrsqrt.f32 %v128_v36  ;;  %v134_v39 = vrot.slane %v133_v37, 1  ;;  %vm138_vm4 = vcmp.eq.f32.partialorder %v128_v36, inf  ;;  %v141_v47 = vand.u32 2147483648, %v128_v36 }
  0xba   :  { %vm140_vm5 = vcmp.eq.f32.partialorder %v128_v36, 0.0  ;;  %v77_v34 = vsub.f32 %v527_v0, %v67_v31 }
  0xbb   :  { %v135_v41 = vadd.f32 %v134_v39, %v133_v37 }
  0xbc   :  { %v79_v39 = vmul.f32 %v77_v34, %v77_v34 }
  0xbd   :  { %375 = vrsqrt.f32 %v135_v41  ;;  %vm145_vm6 = vcmp.eq.f32.partialorder %v135_v41, inf  ;;  %v148_v53 = vand.u32 2147483648, %v135_v41  ;;  %vm147_vm7 = vcmp.eq.f32.partialorder %v135_v41, 0.0 }
  0xbe   :  { %377 = vrcp.f32 %v117_v44 }
  0xc3   :  { %v374_v45 = vpop.eup %373 }
  0xc4   :  { %v137_v46 = vmul.f32 %v374_v45, %v128_v36 }
  0xc6   :  { %v139_v48 = vsel %vm138_vm4, %v128_v36, %v137_v46  ;;  %v74_v36 = vrot.slane %v554_v24, %v566_v29 }
  0xc7   :  { %v142_v49 = vsel %vm140_vm5, %v141_v47, %v139_v48  ;;  %v376_v50 = vpop.eup %375  ;;  %v87_v47 = vsel %vm46_vm0, %v79_v39, 0.0 }
  0xc8   :  { %v150_v51 = vmax.f32 %v142_v49, 1e-12  ;;  %v144_v52 = vmul.f32 %v376_v50, %v135_v41  ;;  %v378_v57 = vpop.eup %377  ;;  %v78_v40 = vsub.f32 %v529_v1, %v74_v36 }
  0xc9   :  { %v119_v58 = vmul.f32 %v378_v57, %v544_v10 }
  0xca   :  { %379 = vrcp.f32 %v150_v51  ;;  %v146_v54 = vsel %vm145_vm6, %v135_v41, %v144_v52  ;;  %v83_v41 = vcombine.high %v79_v39, %v79_v39  ;;  %v80_v42 = vmul.f32 %v78_v40, %v78_v40 }
  0xcb   :  { %v149_v55 = vsel %vm147_vm7, %v148_v53, %v146_v54 }
  0xcc   :  { %v151_v56 = vmax.f32 %v149_v55, 1e-12  ;;  %v88_v45 = vsel %vm46_vm0, %v83_v41, 0.0  ;;  %v84_v46 = vcombine.high %v80_v42, %v80_v42  ;;  %v92_v52 = vsel %vm46_vm0, %v80_v42, 0.0 }
  0xcd   :  { %v89_v48 = vadd.f32 %v88_v45, %v87_v47  ;;  %v260_v47 = vld [vmem:[%s653_s3] sm:$0xf]  ;;  %s473_s3 = smov [#allocation5]  }
  0xce   :  { %381 = vrcp.f32 %v151_v56  ;;  %v93_v51 = vsel %vm46_vm0, %v84_v46, 0.0 }
  0xcf   :  { %v94_v53 = vadd.f32 %v93_v51, %v92_v52 }
  0xd4   :  { %v380_v59 = vpop.eup %379 }
  0xd5   :  { %v153_v60 = vmul.f32 %v380_v59, %v549_v20 }
  0xd7   :  { %v156_v61 = vmul.f32 %v153_v60, %v119_v58 }
  0xd8   :  { %v382_v62 = vpop.eup %381 }
  0xd9   :  { %v158_v63 = vsel %vm102_vm1, %v156_v61, 0.0  ;;  %v155_v2 = vmul.f32 %v382_v62, %v554_v24 }
  0xda   :  { %v159_v3 = vrot.slane %v158_v63, 4 }
  0xdb   :  { %v157_v5 = vmul.f32 %v155_v2, %v119_v58  ;;  %v100_v58 = vld [vmem:[%s652_s2] sm:$0xf] }
  0xdc   :  { %v160_v4 = vadd.f32 %v159_v3, %v158_v63  ;;  %v197_v63 = vsub.f32 %v549_v20, %v544_v10 }
  0xdd   :  { %v165_v7 = vsel %vm102_vm1, %v157_v5, 0.0 }
  0xde   :  { %v161_v6 = vrot.slane %v160_v4, 2  ;;  %v166_v8 = vrot.slane %v165_v7, 4 }
  0xe0   :  { %v162_v9 = vadd.f32 %v161_v6, %v160_v4  ;;  %v167_v11 = vadd.f32 %v166_v8, %v165_v7 }
  0xe2   :  { %v163_v12 = vrot.slane %v162_v9, 1  ;;  %v168_v13 = vrot.slane %v167_v11, 2 }
  0xe4   :  { %v164_v14 = vadd.f32 %v163_v12, %v162_v9  ;;  %v169_v15 = vadd.f32 %v168_v13, %v167_v11  ;;  %v198_v9 = vsub.f32 %v554_v24, %v544_v10 }
  0xe6   :  { %v172_v16 = vmul.f32 14.285714, %v164_v14  ;;  %v170_v17 = vrot.slane %v169_v15, 1 }
  0xe8   :  { %v175_v18 = vsel %vm174_vm8, %v172_v16, -inf  ;;  %v171_v19 = vadd.f32 %v170_v17, %v169_v15 }
  0xe9   :  { %176 = vmax.xlane.f32.xlu1 %v175_v18 }
  0xea   :  { %v173_v21 = vmul.f32 14.285714, %v171_v19 }
  0xec   :  { %v178_v22 = vsel %vm174_vm8, %v173_v21, -inf }
  0xed   :  { %179 = vmax.xlane.f32.xlu1 %v178_v22 }
 0x176   :  { %v177_v30 = vpop.xlane.xlu1 %176 }
 0x177   :  { %v181_v32 = vsub.f32 %v172_v16, %v177_v30 }
 0x179   :  { %v183_v33 = vmul.f32 1.442695, %v181_v32 }
 0x17a   :  { %v180_v35 = vpop.xlane.xlu1 %179 }
 0x17b   :  { %383 = vpow2.f32 %v183_v33  ;;  %v182_v37 = vsub.f32 %v173_v21, %v180_v35 }
 0x17d   :  { %v185_v38 = vmul.f32 1.442695, %v182_v37 }
 0x17f   :  { %385 = vpow2.f32 %v185_v38 }
 0x185   :  { %v384_v43 = vpop.eup %383 }
 0x186   :  { %v187_v44 = vsel %vm174_vm8, %v384_v43, 0.0 }
 0x187   :  { %188 = vadd.xlane.f32.xlu0 %v187_v44 }
 0x189   :  { %v386_v49 = vpop.eup %385 }
 0x18a   :  { %v190_v50 = vsel %vm174_vm8, %v386_v49, 0.0 }
 0x18b   :  { %90 = vadd.xlane.f32.xlu0 %v89_v48  ;;  %191 = vadd.xlane.f32.xlu1 %v190_v50 }
 0x18f   :  { %95 = vadd.xlane.f32.xlu1 %v94_v53  ;;  %v263_v53 = vld [vmem:[%s654_s4] sm:$0xf]  ;;  %s329_s4 = sshll.u32 %s473_s3, 4  ;;  %s330_s4 = int_to_ptr.vmem [resolvable:$true] %s329_s4 }
 0x190   :  { %s417_s19 = scalar_lea.vmem %s330_s4, 256  ;;  %p422_p9 = scmp.lt.s32.totalorder %s330_s4, %s330_s4 }
 0x191   :  { %p418_p8 = scmp.ne.s32.totalorder %s330_s4, %s417_s19  ;;  %p423_p10 = scmp.lt.s32.totalorder %s417_s19, %s417_s19 }
 0x193   :  { %p424_p11 = por %p423_p10, %p422_p9 }
 0x195   :  { %p425_p12 = pnand %p424_p11, %p418_p8 }
 0x214   :  { %v189_v54 = vpop.xlane.xlu0 %188 }
 0x215   :  { %387 = vrcp.f32 %v189_v54 }
 0x218   :  { %v192_v55 = vpop.xlane.xlu1 %191  ;;  %v91_v56 = vpop.xlane.xlu0 %90 }
 0x219   :  { %389 = vrcp.f32 %v192_v55  ;;  %v97_v57 = vmul.f32 0.00390625, %v91_v56 }
 0x21b   :  { %v201_v61 = vsub.f32 %v97_v57, %v100_v58 }
 0x21c   :  { %v96_v59 = vpop.xlane.xlu1 %95 }
 0x21d   :  { %v98_v2 = vmul.f32 0.00390625, %v96_v59 }
 0x21f   :  { %v388_v60 = vpop.eup %387  ;;  %v202_v7 = vsub.f32 %v98_v2, %v100_v58 }
 0x220   :  { %v194_v62 = vmul.f32 %v388_v60, %v384_v43 }
 0x222   :  { %v585_v3 = vmul.f32 %v197_v63, %v194_v62  ;;  %v587_v4 = vmul.f32 %v201_v61, %v194_v62 }
 0x223   :  { %v390_v5 = vpop.eup %389 }
 0x224   :  { %v218_v6 = vadd.f32 %v585_v3, %v544_v10  ;;  %v196_v8 = vmul.f32 %v390_v5, %v386_v49  ;;  %v220_v12 = vadd.f32 %v587_v4, %v100_v58 }
 0x226   :  { %v222_v11 = vsel %vm102_vm1, %v218_v6, 0.0  ;;  %v595_v20 = vmul.f32 %v198_v9, %v196_v8  ;;  %v204_v13 = vmul.f32 %v202_v7, %v196_v8  ;;  %v230_v15 = vsel %vm102_vm1, %v220_v12, 0.0 }
 0x227   :  { %223 = vadd.xlane.f32.xlu0 %v222_v11  ;;  %v238_v16 = vmul.f32 %v218_v6, %v218_v6 }
 0x228   :  { %v219_v14 = vadd.f32 %v595_v20, %v544_v10  ;;  %v221_v18 = vadd.f32 %v204_v13, %v100_v58 }
 0x229   :  { %v240_v24 = vsel %vm102_vm1, %v238_v16, 0.0 }
 0x22a   :  { %v225_v17 = vsel %vm102_vm1, %v219_v14, 0.0  ;;  %v233_v19 = vsel %vm102_vm1, %v221_v18, 0.0  ;;  %v239_v21 = vmul.f32 %v219_v14, %v219_v14 }
 0x22b   :  { %231 = vadd.xlane.f32.xlu0 %v230_v15  ;;  %226 = vadd.xlane.f32.xlu1 %v225_v17 }
 0x22c   :  { %v243_v22 = vsel %vm102_vm1, %v239_v21, 0.0 }
 0x22f   :  { %241 = vadd.xlane.f32.xlu0 %v240_v24  ;;  %234 = vadd.xlane.f32.xlu1 %v233_v19 }
 0x233   :  { %244 = vadd.xlane.f32.xlu1 %v243_v22 }
 0x2b4   :  { %v224_v10 = vpop.xlane.xlu0 %223 }
 0x2b5   :  { %v228_v27 = vmul.f32 0.0625, %v224_v10 }
 0x2b7   :  { %v250_v33 = vmul.f32 %v228_v27, %v228_v27 }
 0x2b8   :  { %v232_v25 = vpop.xlane.xlu0 %231  ;;  %v227_v26 = vpop.xlane.xlu1 %226 }
 0x2b9   :  { %v236_v30 = vmul.f32 0.0625, %v232_v25  ;;  %v229_v35 = vmul.f32 0.0625, %v227_v26 }
 0x2bb   :  { %v251_v41 = vmul.f32 %v229_v35, %v229_v35 }
 0x2bc   :  { %v242_v28 = vpop.xlane.xlu0 %241  ;;  %v235_v31 = vpop.xlane.xlu1 %234 }
 0x2bd   :  { %v246_v32 = vmul.f32 0.0625, %v242_v28  ;;  %v237_v38 = vmul.f32 0.0625, %v235_v31 }
 0x2bf   :  { %v248_v34 = vadd.f32 %v246_v32, %v236_v30 }
 0x2c0   :  { %v245_v37 = vpop.xlane.xlu1 %244 }
 0x2c1   :  { %v252_v36 = vsub.f32 %v248_v34, %v250_v33  ;;  %v247_v39 = vmul.f32 0.0625, %v245_v37 }
 0x2c3   :  { %v254_v40 = vmax.f32 %v252_v36, 0.0  ;;  %v249_v42 = vadd.f32 %v247_v39, %v237_v38 }
 0x2c5   :  { %v256_v43 = vadd.f32 1e-05, %v254_v40  ;;  %v253_v44 = vsub.f32 %v249_v42, %v251_v41 }
 0x2c7   :  { %391 = vrsqrt.f32 %v256_v43  ;;  %v255_v45 = vmax.f32 %v253_v44, 0.0 }
 0x2c9   :  { %v257_v46 = vadd.f32 1e-05, %v255_v45 }
 0x2cb   :  { %393 = vrsqrt.f32 %v257_v46 }
 0x2d1   :  { %v392_v48 = vpop.eup %391 }
 0x2d2   :  { %v261_v49 = vmul.f32 %v392_v48, %v260_v47 }
 0x2d4   :  { %272 = vperm.xlu0 %367, %v261_v49   ;;  %v264_v52 = vmul.f32 %v261_v49, %v228_v27 }
 0x2d5   :  { %v394_v50 = vpop.eup %393 }
 0x2d6   :  { %v262_v51 = vmul.f32 %v394_v50, %v260_v47  ;;  %v266_v54 = vsub.f32 %v263_v53, %v264_v52 }
 0x2d8   :  { %276 = vperm.xlu1 %368, %v262_v51   ;;  %v265_v55 = vmul.f32 %v262_v51, %v229_v35 }
 0x2da   :  { %v267_v56 = vsub.f32 %v263_v53, %v265_v55 }
 0x2dc   :  { %298 = vperm.xlu1 %368, %v266_v54  }
 0x2e0   :  { %302 = vperm.xlu1 %368, %v267_v56  }
 0x2e4   :  { %207 = vrot.lane.b32.xlu1 %v587_v4, %s472_s16 }
 0x2e8   :  { %209 = vrot.lane.b32.xlu1 %v204_v13, %s472_s16 }
 0x353   :  { %v273_v57 = vpop.permute.xlu0 %272 }
 0x354   :  { %v284_v59 = vrot.slane %v273_v57, %v566_v29 }
 0x356   :  { %v294_v61 = vmul.f32 %v284_v59, %v527_v0 }
 0x357   :  { %v277_v58 = vpop.permute.xlu1 %276 }
 0x358   :  { %v291_v62 = vrot.slane %v277_v58, %v566_v29 }
 0x35a   :  { %v295_v6 = vmul.f32 %v291_v62, %v529_v1 }
 0x35b   :  { %v299_v60 = vpop.permute.xlu1 %298 }
 0x35c   :  { %v310_v63 = vrot.slane %v299_v60, %v566_v29 }
 0x35e   :  { %v320_v2 = vadd.f32 %v310_v63, %v294_v61 }
 0x35f   :  { %v303_v5 = vpop.permute.xlu1 %302 }
 0x360   :  { %322 = vst [vmem:[#allocation5] sm:$0xff] %v320_v2  ;;  %v317_v4 = vrot.slane %v303_v5, %v566_v29 }
 0x362   :  { %v321_v7 = vadd.f32 %v317_v4, %v295_v6 }
 0x363   :  { %v208_v8 = vpop.permute.xlu1 %207 }
 0x364   :  { %323 = vst [vmem:[#allocation5 + $0x8] sm:$0xff] %v321_v7  ;;  %v213_v0 = vsel %vm174_vm8, %v585_v3, %v208_v8 }
 0x365   :  { %216 = vst.msk [vmem:[#allocation6] sm:$0xf] %vm215_vm9, %v213_v0 }
 0x366   :  { %428 = shalt.err (!%p425_p12)
}
 0x367   :  { %s429_s22 = scalar_lea.hbm %s655_s5, 256 }
 0x368   :  { %p430_p13 = scmp.ne.s32.totalorder %s655_s5, %s429_s22  ;;  %p433_p0 = scmp.lt.u32.totalorder %s429_s22, %s655_s5 }
 0x36a   :  { %p435_p1 = pnand %p433_p0, %p430_p13 }
 0x36c   :  { %438 = shalt.err (!%p435_p1)
}
 0x36d   :  { %335 = dma.vmem_to_hbm [thread:$0]  %s330_s4, 256, %s655_s5, [#allocation4], %s468_s7, %s468_s7, %s469_s8   ;;  %v210_v1 = vpop.permute.xlu1 %209 }
 0x36e   :  { %v214_v29 = vsel %vm174_vm8, %v595_v20, %v210_v1  ;;  %s439_s29 = scalar_lea.vmem %s342_s18, 128  ;;  %p444_p3 = scmp.lt.s32.totalorder %s342_s18, %s342_s18 }
 0x36f   :  { %217 = vst.msk [vmem:[#allocation6 + $0x4] sm:$0xf] %vm215_vm9, %v214_v29  ;;  %p440_p2 = scmp.ne.s32.totalorder %s342_s18, %s439_s29  ;;  %p445_p4 = scmp.lt.s32.totalorder %s439_s29, %s439_s29 }
 0x371   :  { %p446_p5 = por %p445_p4, %p444_p3 }
 0x373   :  { %p447_p6 = pnand %p446_p5, %p440_p2 }
 0x375   :  { %450 = shalt.err (!%p447_p6)
}
 0x376   :  { %s451_s10 = scalar_lea.hbm %s656_s6, 128 }
 0x377   :  { %p452_p7 = scmp.ne.s32.totalorder %s656_s6, %s451_s10  ;;  %p455_p8 = scmp.lt.u32.totalorder %s451_s10, %s656_s6 }
 0x379   :  { %p457_p9 = pnand %p455_p8, %p452_p7 }
 0x37b   :  { %460 = shalt.err (!%p457_p9)
}
 0x37c   :  { %s475_s11 = smov 64   ;;  %s476_s1 = smov 4  }
 0x37d   :  { %347 = dma.vmem_to_hbm [thread:$0]  %s342_s18, 128, %s656_s6, [#allocation7], %s475_s11, %s475_s11, %s476_s1  }
 0x37e   :  { %463 = dma.done.wait [#allocation4], 256  }
 0x37f   :  { %464 = vsyncadd [#allocation4], 4294967040 }
 0x380   :  { %465 = dma.done.wait [#allocation7], 128  }
 0x381   :  { %466 = vsyncadd [#allocation7], 4294967168 }
 0x382   :  { %354 = vsyncpa [#allocation3], 1 }
 0x383   :  { %355 = vsyncpa [#allocation4], 1 }
 0x384   :  { %356 = vsyncpa [#allocation7], 1 }

</bundles_post_ra>
